<compile_context>
chip_gen: v5e
topology: v5e:2x2
jax: 0.10.0
libtpu: 0.0.40
codegen_flags: <defaults>
</compile_context>

<pallas_src>
import functools

import jax
import jax.numpy as jnp
from jax import lax
from jax.experimental import pallas as pl
from jax.experimental.pallas import tpu as pltpu

_LANE = 128


def _pad_to(n, m):
    return ((n + m - 1) // m) * m


def _pick_tk(dp):
    for tk in (512, 256, 128):
        if dp % tk == 0:
            return min(tk, dp)
    return dp


# ----------------------------------------------------------------------------
# Fused kernel: K-tiled encoder projection for all 3B rows + MNRL loss
# ----------------------------------------------------------------------------
def _fused_kernel(x_ref, w_ref, b_ref, pos_ids_ref, ids_ref,
                  emb_ref, loss_ref, *, batch, scale):
    """Grid: (DP // tk,) over the contraction axis.

       x_ref       [3B, tk] bf16  last-token input-embedding K-tile (anchor|pos|neg)
       w_ref       [tk, HP] bf16  dense projection weight K-tile (zero padded)
       b_ref       [1,  HP] f32   dense projection bias (zero padded)
       pos_ids_ref [B,  1]  i32   positive ids (column)
       ids_ref     [1,  2B] i32   cat(positive_id, negative_id) (row)
       emb_ref     [3B, HP] f32   resident accumulator / sentence embeddings out
       loss_ref    [1,  1]  f32   scalar loss out (SMEM)
    """
    B = batch
    C = 2 * B
    k = pl.program_id(0)

    @pl.when(k == 0)
    def _():
        emb_ref[...] = jnp.zeros_like(emb_ref)

    # MXU: bf16 operands, f32 accumulation into the resident output block.
    emb_ref[...] += jnp.dot(x_ref[...], w_ref[...],
                            preferred_element_type=jnp.float32)

    @pl.when(k == pl.num_programs(0) - 1)
    def _():
        # Synthetic encoder epilogue: h = tanh(x @ W + b)  (f32 on VPU/EUP).
        h = jnp.tanh(emb_ref[...] + b_ref[...])                      # [3B, HP]
        emb_ref[...] = h

        a = h[:B, :]        # anchor embeddings        [B,  HP]
        c = h[B:, :]        # cat(pos, neg) embeddings [2B, HP]

        # util.cos_sim: L2 normalise (norm clamped to eps = 1e-12) then matmul.
        # rsqrt(max(||v||^2, eps^2)) == 1 / max(||v||, eps); `scale` is folded
        # into the smaller anchor operand.
        eps2 = jnp.float32(1e-24)
        a_inv = lax.rsqrt(jnp.maximum(jnp.sum(a * a, axis=-1, keepdims=True), eps2))
        c_inv = lax.rsqrt(jnp.maximum(jnp.sum(c * c, axis=-1, keepdims=True), eps2))
        a_n = (a * (a_inv * jnp.float32(scale))).astype(jnp.bfloat16)
        c_n = (c * c_inv).astype(jnp.bfloat16)

        # scores = scale * cos_sim(anchor, cand); contract last dims of both
        # operands so the MXU consumes the transposed RHS directly.
        scores = lax.dot_general(
            a_n, c_n, (((1,), (1,)), ((), ())),
            preferred_element_type=jnp.float32)                      # [B, 2B]

        # mask = (pos_ids[:, None] == ids[None, :]) with the diagonal cleared.
        same_id = pos_ids_ref[...] == ids_ref[...]                   # [B, 2B]
        row = lax.broadcasted_iota(jnp.int32, (B, C), 0)
        col = lax.broadcasted_iota(jnp.int32, (B, C), 1)
        diag = row == col
        mask = jnp.logical_and(same_id, jnp.logical_not(diag))
        # Large finite fill is numerically identical to -inf (diag never masked).
        scores = jnp.where(mask, jnp.float32(-1e30), scores)

        # Cross-entropy with labels = arange(B), mean reduction.
        row_max = jnp.max(scores, axis=-1, keepdims=True)
        lse = jnp.log(jnp.sum(jnp.exp(scores - row_max),
                              axis=-1, keepdims=True)) + row_max
        correct = jnp.sum(jnp.where(diag, scores, 0.0), axis=-1, keepdims=True)
        loss_ref[0, 0] = jnp.sum(lse - correct) * jnp.float32(1.0 / B)


# ----------------------------------------------------------------------------
# Forward wrapper
# ----------------------------------------------------------------------------
def _last_token_ids(features):
    """Token id of the last valid position of every sequence -> [B] int32."""
    input_ids = features["input_ids"]                 # [B, S] int32
    attention_mask = features["attention_mask"]       # [B, S] int32
    last = jnp.sum(attention_mask, axis=1) - 1        # [B]
    return jnp.take_along_axis(input_ids, last[:, None], axis=1)[:, 0]


def triplet_simcse_forward(params, anchor, positive, negative,
                           positive_id, negative_id, scale=50.0):
    B = anchor["input_ids"].shape[0]
    D = params["emb"].shape[1]
    H = params["w"].shape[1]
    DP = _pad_to(D, _LANE)
    HP = _pad_to(H, _LANE)
    tk = _pick_tk(DP)

    # ONE fused [3B] gather on the UNPADDED table; pad/cast only the small
    # [3B, D] result (zero padding is exact: tanh(0) = 0 downstream).
    tok = jnp.concatenate([_last_token_ids(anchor),
                           _last_token_ids(positive),
                           _last_token_ids(negative)], axis=0)       # [3B]
    x = jnp.take(params["emb"].astype(jnp.float32), tok, axis=0)     # [3B, D]
    x = jnp.pad(x, ((0, 0), (0, DP - D))).astype(jnp.bfloat16)       # [3B, DP]

    w_p = jnp.pad(params["w"].astype(jnp.float32),
                  ((0, DP - D), (0, HP - H))).astype(jnp.bfloat16)   # [DP, HP]
    b_p = jnp.pad(params["b"].astype(jnp.float32), ((0, 0), (0, HP - H)))

    ids = jnp.concatenate(
        [positive_id.astype(jnp.int32), negative_id.astype(jnp.int32)], axis=0)
    pos_ids_col = positive_id.astype(jnp.int32).reshape(B, 1)        # [B, 1]
    ids_row = ids.reshape(1, 2 * B)                                  # [1, 2B]

    # Resident VMEM: double-buffered bf16 x/W K-tiles + b + resident f32 out.
    need = (2 * (3 * B) * tk * 2 + 2 * tk * HP * 2 + 2 * HP * 4
            + 2 * (3 * B) * HP * 4 + 4 * (B + 2 * B) * 4)
    vmem_limit = int(min(max(2 * need, 8 << 20), 100 << 20))

    vmem = pltpu.MemorySpace.VMEM
    emb_all, loss = pl.pallas_call(
        functools.partial(_fused_kernel, batch=B, scale=float(scale)),
        out_shape=(
            jax.ShapeDtypeStruct((3 * B, HP), jnp.float32),
            jax.ShapeDtypeStruct((1, 1), jnp.float32),
        ),
        grid=(DP // tk,),
        in_specs=[
            pl.BlockSpec((3 * B, tk), lambda k: (0, k), memory_space=vmem),  # x
            pl.BlockSpec((tk, HP), lambda k: (k, 0), memory_space=vmem),     # w
            pl.BlockSpec((1, HP), lambda k: (0, 0), memory_space=vmem),      # b
            pl.BlockSpec((B, 1), lambda k: (0, 0), memory_space=vmem),       # pos_ids
            pl.BlockSpec((1, 2 * B), lambda k: (0, 0), memory_space=vmem),   # ids
        ],
        out_specs=(
            pl.BlockSpec((3 * B, HP), lambda k: (0, 0), memory_space=vmem),  # emb
            pl.BlockSpec(memory_space=pltpu.MemorySpace.SMEM),               # loss
        ),
        compiler_params=pltpu.CompilerParams(
            dimension_semantics=("arbitrary",),
            vmem_limit_bytes=vmem_limit),
    )(x, w_p, b_p, pos_ids_col, ids_row)

    emb_all = emb_all[:, :H]                                         # drop pad cols
    return {
        "loss": loss[0, 0],
        "anchor": emb_all[:B],
        "positive": emb_all[B:2 * B],
        "negative": emb_all[2 * B:],
    }


# ----------------------------------------------------------------------------
# Pure-JAX reference (mirrors the PyTorch module, encodes ALL tokens, f32)
# ----------------------------------------------------------------------------
def _reference(params, anchor, positive, negative, positive_id, negative_id,
               scale=50.0):
    def enc(feat):
        ids = feat["input_ids"]
        x = jnp.take(params["emb"], ids, axis=0)                     # [B, S, D]
        h = jnp.tanh(x @ params["w"] + params["b"][0])               # [B, S, H]
        last = jnp.sum(feat["attention_mask"], axis=1) - 1
        return h[jnp.arange(ids.shape[0]), last]

    a, p, n = enc(anchor), enc(positive), enc(negative)
    cand = jnp.concatenate([p, n], axis=0)
    ids = jnp.concatenate([positive_id, negative_id], axis=0)

    def norm(v):
        return v / jnp.maximum(jnp.linalg.norm(v, axis=-1, keepdims=True), 1e-12)

    scores = (norm(a) @ norm(cand).T) * scale
    B = a.shape[0]
    mask = (positive_id[:, None] == ids[None, :]) & ~jnp.eye(B, 2 * B, dtype=bool)
    scores = jnp.where(mask, -jnp.inf, scores)
    logz = jax.scipy.special.logsumexp(scores, axis=-1)
    loss = jnp.mean(logz - scores[jnp.arange(B), jnp.arange(B)])
    return loss, a, p, n


# ----------------------------------------------------------------------------
# Main
# ----------------------------------------------------------------------------
if __name__ == "__main__":
    B, S, D, H, VOCAB = 8, 8, 32, 32, 64

    key = jax.random.PRNGKey(0)
    k_emb, k_w, k_b, k_a, k_p, k_n = jax.random.split(key, 6)

    params = {
        "emb": jax.random.normal(k_emb, (VOCAB, D), jnp.float32) * 0.1,
        "w": jax.random.normal(k_w, (D, H), jnp.float32) * 0.1,
        "b": jax.random.normal(k_b, (1, H), jnp.float32) * 0.01,
    }

    def make_features(k):
        k1, k2 = jax.random.split(k)
        input_ids = jax.random.randint(k1, (B, S), 0, VOCAB, jnp.int32)
        lengths = jax.random.randint(k2, (B,), 2, S + 1, jnp.int32)
        attention_mask = (jnp.arange(S)[None, :] < lengths[:, None]).astype(jnp.int32)
        return {"input_ids": input_ids, "attention_mask": attention_mask}

    anchor = make_features(k_a)
    positive = make_features(k_p)
    negative = make_features(k_n)

    positive_id = jnp.arange(B, dtype=jnp.int32)
    # include one duplicate id so the id-based masking path is exercised
    negative_id = jnp.concatenate(
        [jnp.array([0], jnp.int32), jnp.arange(100, 100 + B - 1, dtype=jnp.int32)]
    )

    out = jax.jit(triplet_simcse_forward)(
        params, anchor, positive, negative, positive_id, negative_id
    )
    jax.block_until_ready(out)

    assert out["anchor"].shape == (B, H)
    assert out["positive"].shape == (B, H)
    assert out["negative"].shape == (B, H)
    assert out["loss"].shape == ()
    assert bool(jnp.isfinite(out["loss"]))

    # Semantic check against the full (all-token) pure-JAX f32 reference.
    ref_loss, ref_a, ref_p, ref_n = jax.jit(_reference)(
        params, anchor, positive, negative, positive_id, negative_id
    )
    assert bool(jnp.allclose(out["anchor"], ref_a, atol=5e-2, rtol=5e-2))
    assert bool(jnp.allclose(out["positive"], ref_p, atol=5e-2, rtol=5e-2))
    assert bool(jnp.allclose(out["negative"], ref_n, atol=5e-2, rtol=5e-2))
    assert bool(jnp.allclose(out["loss"], ref_loss, atol=5e-2, rtol=5e-2))

    print("KERNEL_OK")
</pallas_src>

<mosaic_0001>
module attributes {stable_mosaic.version = 11 : i64} {
  func.func @_fused_kernel(%arg0: i32, %arg1: memref<24x128xbf16, #tpu.memory_space<vmem>>, %arg2: memref<128x128xbf16, #tpu.memory_space<vmem>>, %arg3: memref<1x128xf32, #tpu.memory_space<vmem>>, %arg4: memref<8x1xi32, #tpu.memory_space<vmem>>, %arg5: memref<1x16xi32, #tpu.memory_space<vmem>>, %arg6: memref<24x128xf32, #tpu.memory_space<vmem>>, %arg7: memref<1x1xf32, #tpu.memory_space<smem>>) attributes {dimension_semantics = [#tpu.dimension_semantics<arbitrary>], iteration_bounds = array<i64: 1>, scalar_prefetch = 0 : i64, scratch_operands = 0 : i64, tpu.core_type = #tpu.core_type<tc>, window_params = [{transform_indices = @transform_0, window_bounds = array<i64: 24, 128>}, {transform_indices = @transform_1, window_bounds = array<i64: 128, 128>}, {pipeline_mode = #tpu.pipeline_mode<synchronous>, transform_indices = @transform_2, window_bounds = array<i64: 1, 128>}, {pipeline_mode = #tpu.pipeline_mode<synchronous>, transform_indices = @transform_3, window_bounds = array<i64: 8, 1>}, {pipeline_mode = #tpu.pipeline_mode<synchronous>, transform_indices = @transform_4, window_bounds = array<i64: 1, 16>}, {pipeline_mode = #tpu.pipeline_mode<synchronous>, transform_indices = @transform_5, window_bounds = array<i64: 24, 128>}, {transform_indices = @transform_6, window_bounds = array<i64: 1, 1>}]} {
    %c0_i32 = arith.constant 0 : i32
    %0 = arith.cmpi eq, %arg0, %c0_i32 : i32
    %1 = arith.extui %0 : i1 to i32
    %c0_i32_0 = arith.constant 0 : i32
    %2 = arith.cmpi ne, %1, %c0_i32_0 : i32
    scf.if %2 {
      %cst_10 = arith.constant 0.000000e+00 : f32
      %12 = vector.broadcast %cst_10 : f32 to vector<24x128xf32>
      %c0_11 = arith.constant 0 : index
      %c0_12 = arith.constant 0 : index
      %13 = vector.load %arg6[%c0_11, %c0_12] : memref<24x128xf32, #tpu.memory_space<vmem>>, vector<24x128xf32>
      tpu.vector_store %arg6[%c0_11, %c0_12], %12 {strides = array<i32>} : memref<24x128xf32, #tpu.memory_space<vmem>>, vector<24x128xf32>,
    } else {
    }
    %c0 = arith.constant 0 : index
    %c0_1 = arith.constant 0 : index
    %3 = vector.load %arg6[%c0, %c0_1] : memref<24x128xf32, #tpu.memory_space<vmem>>, vector<24x128xf32>
    %c0_2 = arith.constant 0 : index
    %c0_3 = arith.constant 0 : index
    %4 = vector.load %arg1[%c0_2, %c0_3] : memref<24x128xbf16, #tpu.memory_space<vmem>>, vector<24x128xbf16>
    %c0_4 = arith.constant 0 : index
    %c0_5 = arith.constant 0 : index
    %5 = vector.load %arg2[%c0_4, %c0_5] : memref<128x128xbf16, #tpu.memory_space<vmem>>, vector<128x128xbf16>
    %cst = arith.constant dense<0.000000e+00> : vector<24x128xf32>
    %6 = tpu.matmul %4, %5, %cst {dimension_numbers = #tpu.dot_dimension_numbers<[1], [0], [0], [1], [0, 0, 1, 1], [], []>} : vector<24x128xbf16>, vector<128x128xbf16>, vector<24x128xf32> -> vector<24x128xf32>
    %7 = arith.addf %3, %6 : vector<24x128xf32>
    %c0_6 = arith.constant 0 : index
    %c0_7 = arith.constant 0 : index
    %8 = vector.load %arg6[%c0_6, %c0_7] : memref<24x128xf32, #tpu.memory_space<vmem>>, vector<24x128xf32>
    tpu.vector_store %arg6[%c0_6, %c0_7], %7 {strides = array<i32>} : memref<24x128xf32, #tpu.memory_space<vmem>>, vector<24x128xf32>,
    %c0_i32_8 = arith.constant 0 : i32
    %9 = arith.cmpi eq, %arg0, %c0_i32_8 : i32
    %10 = arith.extui %9 : i1 to i32
    %c0_i32_9 = arith.constant 0 : i32
    %11 = arith.cmpi ne, %10, %c0_i32_9 : i32
    scf.if %11 {
      %c0_10 = arith.constant 0 : index
      %c0_11 = arith.constant 0 : index
      %12 = vector.load %arg6[%c0_10, %c0_11] : memref<24x128xf32, #tpu.memory_space<vmem>>, vector<24x128xf32>
      %c0_12 = arith.constant 0 : index
      %c0_13 = arith.constant 0 : index
      %13 = vector.load %arg3[%c0_12, %c0_13] : memref<1x128xf32, #tpu.memory_space<vmem>>, vector<1x128xf32>
      %14 = vector.broadcast %13 : vector<1x128xf32> to vector<24x128xf32>
      %15 = arith.addf %12, %14 : vector<24x128xf32>
      %16 = math.tanh %15 : vector<24x128xf32>
      %c0_14 = arith.constant 0 : index
      %c0_15 = arith.constant 0 : index
      %17 = vector.load %arg6[%c0_14, %c0_15] : memref<24x128xf32, #tpu.memory_space<vmem>>, vector<24x128xf32>
      tpu.vector_store %arg6[%c0_14, %c0_15], %16 {strides = array<i32>} : memref<24x128xf32, #tpu.memory_space<vmem>>, vector<24x128xf32>,
      %18 = vector.extract_strided_slice %16 {offsets = [0, 0], sizes = [8, 128], strides = [1, 1]} : vector<24x128xf32> to vector<8x128xf32>
      %19 = vector.extract_strided_slice %16 {offsets = [8, 0], sizes = [16, 128], strides = [1, 1]} : vector<24x128xf32> to vector<16x128xf32>
      %20 = arith.mulf %18, %18 : vector<8x128xf32>
      %cst_16 = arith.constant dense<0.000000e+00> : vector<8xf32>
      %21 = vector.multi_reduction <add>, %20, %cst_16 [1] : vector<8x128xf32> to vector<8xf32>
      %22 = vector.shape_cast %21 : vector<8xf32> to vector<8x1xf32>
      %cst_17 = arith.constant 1.000000e-24 : f32
      %23 = vector.broadcast %cst_17 : f32 to vector<8x1xf32>
      %24 = arith.maximumf %22, %23 : vector<8x1xf32>
      %25 = math.rsqrt %24 : vector<8x1xf32>
      %26 = arith.mulf %19, %19 : vector<16x128xf32>
      %cst_18 = arith.constant dense<0.000000e+00> : vector<16xf32>
      %27 = vector.multi_reduction <add>, %26, %cst_18 [1] : vector<16x128xf32> to vector<16xf32>
      %28 = vector.shape_cast %27 : vector<16xf32> to vector<16x1xf32>
      %cst_19 = arith.constant 1.000000e-24 : f32
      %29 = vector.broadcast %cst_19 : f32 to vector<16x1xf32>
      %30 = arith.maximumf %28, %29 : vector<16x1xf32>
      %31 = math.rsqrt %30 : vector<16x1xf32>
      %cst_20 = arith.constant 5.000000e+01 : f32
      %32 = vector.broadcast %cst_20 : f32 to vector<8x1xf32>
      %33 = arith.mulf %25, %32 : vector<8x1xf32>
      %34 = vector.broadcast %33 : vector<8x1xf32> to vector<8x128xf32>
      %35 = arith.mulf %18, %34 : vector<8x128xf32>
      %36 = arith.truncf %35 : vector<8x128xf32> to vector<8x128xbf16>
      %37 = vector.broadcast %31 : vector<16x1xf32> to vector<16x128xf32>
      %38 = arith.mulf %19, %37 : vector<16x128xf32>
      %39 = arith.truncf %38 : vector<16x128xf32> to vector<16x128xbf16>
      %cst_21 = arith.constant dense<0.000000e+00> : vector<8x16xf32>
      %40 = tpu.matmul %36, %39, %cst_21 {dimension_numbers = #tpu.dot_dimension_numbers<[1], [1], [0], [0], [0, 0, 1, 0], [], []>} : vector<8x128xbf16>, vector<16x128xbf16>, vector<8x16xf32> -> vector<8x16xf32>
      %c0_22 = arith.constant 0 : index
      %c0_23 = arith.constant 0 : index
      %41 = vector.load %arg4[%c0_22, %c0_23] : memref<8x1xi32, #tpu.memory_space<vmem>>, vector<8x1xi32>
      %c0_24 = arith.constant 0 : index
      %c0_25 = arith.constant 0 : index
      %42 = vector.load %arg5[%c0_24, %c0_25] : memref<1x16xi32, #tpu.memory_space<vmem>>, vector<1x16xi32>
      %43 = vector.broadcast %41 : vector<8x1xi32> to vector<8x16xi32>
      %44 = vector.broadcast %42 : vector<1x16xi32> to vector<8x16xi32>
      %45 = arith.cmpi eq, %43, %44 : vector<8x16xi32>
      %46 = tpu.iota {dimensions = array<i32: 0>} : vector<8x16xi32>
      %47 = tpu.iota {dimensions = array<i32: 1>} : vector<8x16xi32>
      %48 = arith.cmpi eq, %46, %47 : vector<8x16xi32>
      %cst_26 = arith.constant dense<true> : vector<8x16xi1>
      %49 = arith.xori %48, %cst_26 : vector<8x16xi1>
      %50 = arith.andi %45, %49 : vector<8x16xi1>
      %cst_27 = arith.constant -1.000000e+30 : f32
      %51 = vector.broadcast %cst_27 : f32 to vector<8x16xf32>
      %52 = arith.select %50, %51, %40 : vector<8x16xi1>, vector<8x16xf32>
      %cst_28 = arith.constant dense<0xFF800000> : vector<8xf32>
      %53 = vector.multi_reduction <maximumf>, %52, %cst_28 [1] : vector<8x16xf32> to vector<8xf32>
      %54 = vector.shape_cast %53 : vector<8xf32> to vector<8x1xf32>
      %55 = vector.broadcast %54 : vector<8x1xf32> to vector<8x16xf32>
      %56 = arith.subf %52, %55 : vector<8x16xf32>
      %57 = math.exp %56 : vector<8x16xf32>
      %cst_29 = arith.constant dense<0.000000e+00> : vector<8xf32>
      %58 = vector.multi_reduction <add>, %57, %cst_29 [1] : vector<8x16xf32> to vector<8xf32>
      %59 = vector.shape_cast %58 : vector<8xf32> to vector<8x1xf32>
      %60 = math.log %59 : vector<8x1xf32>
      %61 = arith.addf %60, %54 : vector<8x1xf32>
      %cst_30 = arith.constant 0.000000e+00 : f32
      %62 = vector.broadcast %cst_30 : f32 to vector<8x16xf32>
      %63 = arith.select %48, %52, %62 : vector<8x16xi1>, vector<8x16xf32>
      %cst_31 = arith.constant dense<0.000000e+00> : vector<8xf32>
      %64 = vector.multi_reduction <add>, %63, %cst_31 [1] : vector<8x16xf32> to vector<8xf32>
      %65 = vector.shape_cast %64 : vector<8xf32> to vector<8x1xf32>
      %66 = arith.subf %61, %65 : vector<8x1xf32>
      %67 = vector.shape_cast %66 : vector<8x1xf32> to vector<1x8x1xf32>
      %cst_32 = arith.constant dense<0.000000e+00> : vector<1xf32>
      %68 = vector.multi_reduction <add>, %67, %cst_32 [1, 2] : vector<1x8x1xf32> to vector<1xf32>
      %69 = vector.shape_cast %68 : vector<1xf32> to vector<1x1x1xf32>
      %70 = vector.extract %69[0, 0, 0] : f32 from vector<1x1x1xf32>
      %cst_33 = arith.constant 1.250000e-01 : f32
      %71 = arith.mulf %70, %cst_33 : f32
      %c0_34 = arith.constant 0 : index
      %c0_35 = arith.constant 0 : index
      %72 = memref.load %arg7[%c0_34, %c0_35] : memref<1x1xf32, #tpu.memory_space<smem>>
      memref.store %71, %arg7[%c0_34, %c0_35] : memref<1x1xf32, #tpu.memory_space<smem>>
    } else {
    }
    return
  }
  func.func @transform_0(%arg0: i32) -> (i32, i32) {
    %c0_i32 = arith.constant 0 : i32
    %c0_i32_0 = arith.constant 0 : i32
    return %c0_i32, %arg0 : i32, i32
  }
  func.func @transform_1(%arg0: i32) -> (i32, i32) {
    %c0_i32 = arith.constant 0 : i32
    %c0_i32_0 = arith.constant 0 : i32
    return %arg0, %c0_i32 : i32, i32
  }
  func.func @transform_2(%arg0: i32) -> (i32, i32) {
    %c0_i32 = arith.constant 0 : i32
    %c0_i32_0 = arith.constant 0 : i32
    %c0_i32_1 = arith.constant 0 : i32
    return %c0_i32, %c0_i32_0 : i32, i32
  }
  func.func @transform_3(%arg0: i32) -> (i32, i32) {
    %c0_i32 = arith.constant 0 : i32
    %c0_i32_0 = arith.constant 0 : i32
    %c0_i32_1 = arith.constant 0 : i32
    return %c0_i32, %c0_i32_0 : i32, i32
  }
  func.func @transform_4(%arg0: i32) -> (i32, i32) {
    %c0_i32 = arith.constant 0 : i32
    %c0_i32_0 = arith.constant 0 : i32
    %c0_i32_1 = arith.constant 0 : i32
    return %c0_i32, %c0_i32_0 : i32, i32
  }
  func.func @transform_5(%arg0: i32) -> (i32, i32) {
    %c0_i32 = arith.constant 0 : i32
    %c0_i32_0 = arith.constant 0 : i32
    %c0_i32_1 = arith.constant 0 : i32
    return %c0_i32, %c0_i32_0 : i32, i32
  }
  func.func @transform_6(%arg0: i32) -> (i32, i32) {
    %c0_i32 = arith.constant 0 : i32
    %c0_i32_0 = arith.constant 0 : i32
    %c0_i32_1 = arith.constant 0 : i32
    return %c0_i32, %c0_i32_0 : i32, i32
  }
}

</mosaic_0001>

<bundles_post_ra>
// kernel: triplet_simcse_forward.1
= control target key start
LH: loop header
LB: loop body
LE: loop exit
PB: predicated region body
PF: predicated region fallthrough
CT: control target
= control target key end

     0   :  { %s469_s0 = inlined_call_operand.vmem [shape: bf16[24,128], index: 0, kind: input, shape index: {}]   ;;  %s470_s1 = inlined_call_operand.vmem [shape: bf16[128,128], index: 1, kind: input, shape index: {}]   ;;  %s471_s2 = inlined_call_operand.vmem [shape: f32[1,128], index: 2, kind: input, shape index: {}]   ;;  %s472_s3 = inlined_call_operand.vmem [shape: s32[8,1], index: 3, kind: input, shape index: {}]   ;;  %s473_s4 = inlined_call_operand.vmem [shape: s32[1,16], index: 4, kind: input, shape index: {}]   ;;  %s474_s5 = inlined_call_operand.vmem [shape: f32[24,128], index: 5, kind: output, shape index: {0}]   ;;  %s475_s6 = inlined_call_operand.hbm [shape: f32[1,1], index: 6, kind: output, shape index: {1}]  }
   0x1   :  { %v325_v0 = vld [vmem:[%s470_s1 + $0x38] sm:$0xff]  ;;  %v324_v1 = vld [vmem:[%s470_s1 + $0x30] sm:$0xff] }
   0x2   :  { %111 = vmatpush.bf16.msra.mxu0 %v325_v0  ;;  %326 = vmatpush.bf16.msra.mxu2 %v325_v0 }
   0x3   :  { %12 = vsyncpa [#allocation3], 0  ;;  %v323_v2 = vld [vmem:[%s470_s1 + $0x28] sm:$0xff]  ;;  %v322_v3 = vld [vmem:[%s470_s1 + $0x20] sm:$0xff]  ;;  %v374_v36 = vmov 0   ;;  %v222_v61 = vlaneseq  ;;  %vm375_vm11 = vmmov 1  }
   0x4   :  { %v321_v4 = vld [vmem:[%s470_s1 + $0x18] sm:$0xff]  ;;  %v320_v5 = vld [vmem:[%s470_s1 + $0x10] sm:$0xff]  ;;  %v319_v6 = vld [vmem:[%s470_s1 + $0x8] sm:$0xff]  ;;  %340 = vset.pattern.permute.xlu1 %v374_v36  ;;  %341 = vset.pattern.permute.xlu0 %v374_v36  ;;  %vm230_vm14 = vcmask 130048   ;;  %vm248_vm15 = vcmask 7168   ;;  %s269_s25 = sshll.u32 %s475_s6, 4  ;;  %s270_s25 = int_to_ptr.hbm [resolvable:$true] %s269_s25 }
   0x5   :  { %v36_v7 = vld [vmem:[%s469_s0 + $0x8] sm:$0xf]  ;;  %v318_v9 = vld [vmem:[%s470_s1] sm:$0xff]  ;;  %v223_v62 = vshrl.u32 %v222_v61, 7  ;;  %v225_v63 = vand.u32 127, %v222_v61  ;;  %s376_s28 = smov [#allocation2]  }
   0x6   :  { %112 = vmatpush.bf16.msra.mxu0 %v324_v1  ;;  %327 = vmatpush.bf16.msra.mxu2 %v324_v1  ;;  %v58_v8 = vunpack.c.l.b16 %v36_v7  ;;  %v317_v10 = vld [vmem:[%s469_s0] sm:$0xff] }
   0x7   :  { %v342_v12 = vld [vmem:[%s471_s2] ss:$0 sm:$0xff]  ;;  %vm226_vm9 = vcmp.eq.s32.totalorder %v223_v62, %v225_v63 }
   0x8   :  { %v60_v11 = vpack.c.b16 %v58_v8, %v58_v8  ;;  %v215_v33 = vld [vmem:[%s472_s3] sm:$0xff]  ;;  %vm227_vm12 = vmxor %vm226_vm9, %vm375_vm11 }
   0x9   :  { %v343_v0 = vld [vmem:[%s473_s4] ss:$0 sm:$0xff] }
   0xa   :  { %113 = vmatpush.bf16.msra.mxu0 %v323_v2  ;;  %328 = vmatpush.bf16.msra.mxu2 %v323_v2 }
   0xe   :  { %114 = vmatpush.bf16.msra.mxu0 %v322_v3  ;;  %329 = vmatpush.bf16.msra.mxu2 %v322_v3 }
  0x12   :  { %115 = vmatpush.bf16.msra.mxu0 %v321_v4  ;;  %330 = vmatpush.bf16.msra.mxu2 %v321_v4 }
  0x16   :  { %116 = vmatpush.bf16.msra.mxu0 %v320_v5  ;;  %331 = vmatpush.bf16.msra.mxu2 %v320_v5 }
  0x1a   :  { %117 = vmatpush.bf16.msra.mxu0 %v319_v6  ;;  %332 = vmatpush.bf16.msra.mxu2 %v319_v6 }
  0x1e   :  { %118 = vmatpush.bf16.msra.mxu0 %v318_v9  ;;  %333 = vmatpush.bf16.msra.mxu2 %v318_v9 }
  0x21   :  { %119 = vmatmul.bf16.vlgmr.msra.gmra.mxu0 %v317_v10  ;;  %124 = vmatmul.bf16.vlgmr.msra.gmra.mxu2 %v60_v11 }
  0x9e   :  { %v120_v13 = vpop.f32.mrf.mxu0 }
  0x9f   :  { %v145_v14 = vadd.f32 %v342_v12, %v120_v13 }
  0xa1   :  { %344 = vtanh.f32 %v145_v14 }
  0xa4   :  { %v125_v15 = vpop.f32.mrf.mxu2 }
  0xa5   :  { %v147_v17 = vadd.f32 %v342_v12, %v125_v15 }
  0xa6   :  { %v122_v16 = vpop.f32.mrf.mxu0 }
  0xa7   :  { %v445_v18 = vpop.eup %344  ;;  %v146_v19 = vadd.f32 %v342_v12, %v122_v16  ;;  %346 = vtanh.f32 %v147_v17 }
  0xa8   :  { %151 = vst [vmem:[%s474_s5] sm:$0xff] %v445_v18  ;;  %v154_v20 = vmul.f32 %v445_v18, %v445_v18 }
  0xa9   :  { %348 = vtanh.f32 %v146_v19 }
  0xaa   :  { %155 = vadd.xlane.f32.xlu1 %v154_v20 }
  0xac   :  { %v127_v21 = vpop.f32.mrf.mxu2 }
  0xad   :  { %v347_v22 = vpop.eup %346 }
  0xae   :  { %153 = vst [vmem:[%s474_s5 + $0x10] sm:$0xff] %v347_v22  ;;  %v169_v25 = vmul.f32 %v347_v22, %v347_v22 }
  0xaf   :  { %v349_v23 = vpop.eup %348 }
  0xb0   :  { %152 = vst [vmem:[%s474_s5 + $0x8] sm:$0xff] %v349_v23  ;;  %v168_v24 = vmul.f32 %v349_v23, %v349_v23 }
  0xb2   :  { %170 = vadd.xlane.f32.xlu0 %v168_v24 }
  0xba   :  { %172 = vadd.xlane.f32.xlu0 %v169_v25 }
  0xc3   :  { %218 = vperm.xlu1 %340, %v215_v33  }
 0x11d   :  { %v156_v26 = vpop.xlane.xlu1 %155 }
 0x11e   :  { %v157_v27 = vmax.f32 %v156_v26, 1e-24 }
 0x120   :  { %350 = vrsqrt.f32 %v157_v27  ;;  %vm164_vm4 = vweird.f32 %v157_v27 }
 0x125   :  { %v171_v28 = vpop.xlane.xlu0 %170 }
 0x126   :  { %v174_v29 = vmax.f32 %v171_v28, 1e-24  ;;  %v351_v30 = vpop.eup %350 }
 0x127   :  { %v159_v31 = vmul.f32 %v351_v30, %v157_v27  ;;  %vm165_vm1 = vweird.f32 %v351_v30 }
 0x128   :  { %352 = vrsqrt.f32 %v174_v29  ;;  %vm182_vm2 = vweird.f32 %v174_v29  ;;  %vm166_vm6 = vmor %vm164_vm4, %vm165_vm1 }
 0x129   :  { %v160_v38 = vmul.f32 %v351_v30, %v159_v31 }
 0x12b   :  { %v161_v41 = vmul.f32 0.5, %v160_v38 }
 0x12d   :  { %v173_v32 = vpop.xlane.xlu0 %172  ;;  %v162_v45 = vsub.f32 1.5, %v161_v41 }
 0x12e   :  { %v353_v34 = vpop.eup %352  ;;  %v175_v35 = vmax.f32 %v173_v32, 1e-24 }
 0x12f   :  { %v177_v37 = vmul.f32 %v353_v34, %v174_v29  ;;  %vm183_vm0 = vweird.f32 %v353_v34  ;;  %v163_v49 = vmul.f32 %v351_v30, %v162_v45 }
 0x130   :  { %354 = vrsqrt.f32 %v175_v35  ;;  %vm184_vm5 = vmor %vm182_vm2, %vm183_vm0  ;;  %vm192_vm7 = vweird.f32 %v175_v35 }
 0x131   :  { %v178_v39 = vmul.f32 %v353_v34, %v177_v37  ;;  %v167_v53 = vsel %vm166_vm6, %v351_v30, %v163_v49 }
 0x132   :  { %v196_v57 = vmul.f32 50.0, %v167_v53 }
 0x133   :  { %v179_v40 = vmul.f32 0.5, %v178_v39 }
 0x134   :  { %v197_v59 = vmul.f32 %v445_v18, %v196_v57 }
 0x135   :  { %v180_v43 = vsub.f32 1.5, %v179_v40  ;;  %v219_v1 = vpop.permute.xlu1 %218 }
 0x136   :  { %v355_v42 = vpop.eup %354  ;;  %v198_v60 = vpack.c.bf16 %v197_v59, %v197_v59  ;;  %vm221_vm10 = vcmp.eq.s32.totalorder %v219_v1, %v343_v0 }
 0x137   :  { %v187_v44 = vmul.f32 %v355_v42, %v175_v35  ;;  %v181_v48 = vmul.f32 %v353_v34, %v180_v43  ;;  %vm193_vm3 = vweird.f32 %v355_v42  ;;  %vm228_vm13 = vmand %vm221_vm10, %vm227_vm12 }
 0x138   :  { %vm194_vm8 = vmor %vm192_vm7, %vm193_vm3 }
 0x139   :  { %v188_v46 = vmul.f32 %v355_v42, %v187_v44  ;;  %v185_v51 = vsel %vm184_vm5, %v353_v34, %v181_v48 }
 0x13a   :  { %v199_v55 = vmul.f32 %v349_v23, %v185_v51 }
 0x13b   :  { %v189_v47 = vmul.f32 0.5, %v188_v46 }
 0x13d   :  { %v190_v50 = vsub.f32 1.5, %v189_v47 }
 0x13f   :  { %v191_v52 = vmul.f32 %v355_v42, %v190_v50 }
 0x141   :  { %v195_v54 = vsel %vm194_vm8, %v355_v42, %v191_v52 }
 0x142   :  { %v200_v56 = vmul.f32 %v347_v22, %v195_v54 }
 0x144   :  { %v201_v58 = vpack.c.bf16 %v200_v56, %v199_v55 }
 0x146   :  { %209 = vmatpush.bf16.xpose.msra.mxu1 %v201_v58 }
 0x14d   :  { %210 = vmatmul.bf16.vlgmr.msra.gmra.mxu1 %v198_v60 }
 0x1ca   :  { %v211_v2 = vpop.f32.mrf.mxu1 }
 0x1cb   :  { %v229_v3 = vsel %vm228_vm13, -1e+30, %v211_v2 }
 0x1cc   :  { %v231_v4 = vsel %vm230_vm14, %v229_v3, -inf  ;;  %v243_v5 = vsel %vm226_vm9, %v229_v3, 0.0 }
 0x1cd   :  { %232 = vmax.xlane.f32.xlu2 %v231_v4  ;;  %v244_v6 = vsel %vm230_vm14, %v243_v5, 0.0 }
 0x1ce   :  { %245 = vadd.xlane.f32.xlu0 %v244_v6 }
 0x1d2   :  { %v213_v7 = vpop.f32.mrf.mxu1 }
 0x240   :  { %v233_v8 = vpop.xlane.xlu2 %232 }
 0x241   :  { %v234_v9 = vsub.f32 %v229_v3, %v233_v8  ;;  %v246_v17 = vpop.xlane.xlu0 %245 }
 0x243   :  { %v235_v10 = vmul.f32 1.442695, %v234_v9 }
 0x245   :  { %356 = vpow2.f32 %v235_v10 }
 0x24b   :  { %v357_v11 = vpop.eup %356 }
 0x24c   :  { %v237_v12 = vsel %vm230_vm14, %v357_v11, 0.0 }
 0x24d   :  { %238 = vadd.xlane.f32.xlu2 %v237_v12 }
 0x2c0   :  { %v239_v13 = vpop.xlane.xlu2 %238 }
 0x2c1   :  { %358 = vlog2.f32 %v239_v13 }
 0x2c7   :  { %v359_v14 = vpop.eup %358 }
 0x2c8   :  { %v241_v15 = vmul.f32 0.6931472, %v359_v14 }
 0x2ca   :  { %v242_v16 = vadd.f32 %v241_v15, %v233_v8 }
 0x2cc   :  { %v247_v18 = vsub.f32 %v242_v16, %v246_v17 }
 0x2ce   :  { %v249_v19 = vsel %vm248_vm15, %v247_v18, 0.0 }
 0x2cf   :  { %250 = vadd.xlane.f32.xlu2 %v249_v19 }
 0x342   :  { %v251_v20 = vpop.xlane.xlu2 %250 }
 0x343   :  { %v252_v21 = vrot.slane %v251_v20, 4 }
 0x345   :  { %v253_v22 = vadd.f32 %v252_v21, %v251_v20 }
 0x347   :  { %v254_v23 = vrot.slane %v253_v22, 2 }
 0x349   :  { %v255_v24 = vadd.f32 %v254_v23, %v253_v22 }
 0x34b   :  { %v256_v25 = vrot.slane %v255_v24, 1 }
 0x34d   :  { %v257_v26 = vadd.f32 %v256_v25, %v255_v24 }
 0x34f   :  { %334 = vpush %v257_v26 }
 0x380   :  { %s335_s26 = spop %334 }
 0x381   :  { %s259_s27 = smul.f32 0.125, %s335_s26 }
 0x383   :  { %261 = sst [smem:[#allocation2]] %s259_s27 }
 0x384   :  { %272 = dma.smem_to_hbm %s376_s28, 16, %s270_s25, [#allocation3]  }
 0x385   :  { %372 = dma.done.wait [#allocation3], 16  }
 0x386   :  { %373 = vsyncadd [#allocation3], 4294967280 }
 0x387   :  { %279 = sfence }
 0x388   :  { %280 = vsyncpa [#allocation3], 1 }

</bundles_post_ra>
